<compile_context>
chip_gen: v6e
topology: v6e:2x2x1
jax: 0.10.0
libtpu: 0.0.40
codegen_flags: <defaults>
</compile_context>

<pallas_src>
import functools

import jax
import jax.numpy as jnp
import numpy as np
from jax.experimental import pallas as pl
from jax.experimental.pallas import tpu as pltpu


def _contrastive_kernel(tcol_ref, trow_ref, negcnt_ref, xq_ref, xk_ref,
                        loss_ref, cnt_ref, *, margin, tq, n):
    q = pl.program_id(1)

    xq = xq_ref[0]                      # (tq, d), native dtype (anchor rows)
    xk = xk_ref[0]                      # (n, d),  native dtype (all rows)

    # Gram tile on the MXU, contracting d against d -> no transpose/relayout.
    s = jax.lax.dot_general(
        xq, xk, dimension_numbers=(((1,), (1,)), ((), ())),
        preferred_element_type=jnp.float32)                     # (tq, n) f32

    t_col = tcol_ref[...]               # (tq, 1) int32 anchor labels
    t_row = trow_ref[...]               # (1, n)  int32 all labels
    eq = t_col == t_row                 # (tq, n) bool

    # Short VPU epilogue: one compare, two selects, one relu.
    pos_mask = jnp.logical_and(eq, s < 1.0)
    pos_vals = jnp.where(pos_mask, s, 0.0)
    posf = pos_mask.astype(jnp.float32)
    neg_vals = jnp.where(eq, 0.0, jnp.maximum(s - margin, 0.0))

    # Row reductions as mat-vec with a ones column on the MXU (idle at small d)
    # instead of XLU cross-lane sums.
    ones_col = jnp.ones((n, 1), jnp.float32)
    dn = (((1,), (0,)), ((), ()))
    pos_sum = jax.lax.dot_general(pos_vals, ones_col, dn,
                                  preferred_element_type=jnp.float32)  # (tq,1)
    pos_cnt = jax.lax.dot_general(posf, ones_col, dn,
                                  preferred_element_type=jnp.float32)  # (tq,1)
    neg_sum = jax.lax.dot_general(neg_vals, ones_col, dn,
                                  preferred_element_type=jnp.float32)  # (tq,1)

    neg_cnt = negcnt_ref[...]           # (tq, 1) f32, precomputed in wrapper

    # Rows in the padded tail of the last anchor tile must not contribute.
    row_id = q * tq + jax.lax.broadcasted_iota(jnp.int32, (tq, 1), 0)
    valid = jnp.logical_and(
        jnp.logical_and(pos_cnt >= 1.0, neg_cnt >= 1.0), row_id < n)

    pos_mean = pos_sum / jnp.maximum(pos_cnt, 1.0)
    neg_mean = neg_sum / jnp.maximum(neg_cnt, 1.0)
    row_loss = jnp.where(valid, neg_mean - pos_mean, 0.0)       # (tq, 1)
    validf = valid.astype(jnp.float32)

    block_loss = jnp.sum(row_loss, axis=0, keepdims=True)       # (1, 1)
    block_cnt = jnp.sum(validf, axis=0, keepdims=True)          # (1, 1)

    # Lane-dense 128-wide stores (no masked vst), one per output.
    loss_ref[0, 0] = jnp.broadcast_to(block_loss, (1, 128))
    cnt_ref[0, 0] = jnp.broadcast_to(block_cnt, (1, 128))


def contrastive_loss(outputs, target, margin=0.5, max_tq=256):
    """outputs: (m, n, d) float (f32 or bf16); target: (n,) int -> scalar f32 loss."""
    m, n, d = outputs.shape
    # Anchor-row tile: full n when small, otherwise a multiple-of-8 tile so the
    # S working set stays bounded (mandatory for v7x's 64 MiB VMEM at large n).
    tq = n if n <= max_tq else max_tq
    nq = pl.cdiv(n, tq)

    tgt = target.astype(jnp.int32)
    t_col = tgt.reshape(n, 1)
    t_row = tgt.reshape(1, n)
    # Label-only work hoisted out of the per-(i, q) kernel body: negative-pair
    # counts are identical for every grid step.
    neg_cnt = (n - jnp.sum(t_col == t_row, axis=1, keepdims=True)).astype(jnp.float32)

    kernel = functools.partial(_contrastive_kernel,
                               margin=float(margin), tq=tq, n=n)

    loss_parts, valid_parts = pl.pallas_call(
        kernel,
        out_shape=(
            jax.ShapeDtypeStruct((m, nq, 1, 128), jnp.float32),
            jax.ShapeDtypeStruct((m, nq, 1, 128), jnp.float32),
        ),
        grid=(m, nq),
        in_specs=[
            pl.BlockSpec((tq, 1), lambda i, q: (q, 0)),         # anchor labels
            pl.BlockSpec((1, n), lambda i, q: (0, 0)),          # all labels
            pl.BlockSpec((tq, 1), lambda i, q: (q, 0)),         # neg counts
            pl.BlockSpec((1, tq, d), lambda i, q: (i, q, 0)),   # anchor rows of output[i]
            pl.BlockSpec((1, n, d), lambda i, q: (i, 0, 0)),    # all rows of output[i]
        ],
        out_specs=(
            pl.BlockSpec((1, 1, 1, 128), lambda i, q: (i, q, 0, 0)),
            pl.BlockSpec((1, 1, 1, 128), lambda i, q: (i, q, 0, 0)),
        ),
        compiler_params=pltpu.CompilerParams(
            dimension_semantics=("parallel", "parallel"),
            vmem_limit_bytes=48 * 1024 * 1024,
        ),
    )(t_col, t_row, neg_cnt, outputs, outputs)

    per_i_loss = jnp.sum(loss_parts[:, :, 0, 0], axis=1)        # (m,)
    per_i_valid = jnp.sum(valid_parts[:, :, 0, 0], axis=1)      # (m,)
    # TODO(synk): PyTorch raises ZeroDivisionError when every row of a batch is
    # skipped; we clamp the denominator to 1 instead of reproducing the exception.
    loss_i = per_i_loss / jnp.maximum(per_i_valid, 1.0)
    return jnp.mean(loss_i)


def _reference_loss(outputs, target, margin=0.5):
    outputs = np.asarray(outputs, dtype=np.float32)
    target = np.asarray(target)
    m, n, _ = outputs.shape
    losses = []
    for i in range(m):
        S = outputs[i] @ outputs[i].T
        temp = []
        for j in range(n):
            row = S[j]
            pos = row[(target == target[j]) & (row < 1.0)]
            neg = row[target != target[j]]
            if len(pos) < 1 or len(neg) < 1:
                continue
            temp.append(np.mean(np.maximum(neg - margin, 0.0)) - np.mean(pos))
        losses.append(sum(temp) / len(temp))
    return float(sum(losses) / len(losses))


if __name__ == "__main__":
    key = jax.random.PRNGKey(0)
    m, n, d = 2, 8, 32
    kx, _ = jax.random.split(key)
    # Small scale so some positive-pair similarities fall below 1 (mirrors the
    # pos_pair < 1 filter in the PyTorch code).
    outputs = 0.1 * jax.random.normal(kx, (m, n, d), dtype=jnp.float32)
    target = jnp.array([0, 0, 1, 1, 2, 2, 0, 1], dtype=jnp.int32)

    loss = contrastive_loss(outputs, target, margin=0.5)
    loss = jax.block_until_ready(loss)

    ref = _reference_loss(np.asarray(outputs), np.asarray(target), margin=0.5)
    np.testing.assert_allclose(float(loss), ref, rtol=1e-5, atol=1e-6)
    print("KERNEL_OK")
</pallas_src>

<mosaic_0001>
module attributes {stable_mosaic.version = 11 : i64} {
  func.func @_contrastive_kernel(%arg0: i32, %arg1: i32, %arg2: memref<8x1xi32, #tpu.memory_space<vmem>>, %arg3: memref<1x8xi32, #tpu.memory_space<vmem>>, %arg4: memref<8x1xf32, #tpu.memory_space<vmem>>, %arg5: memref<1x8x32xf32, #tpu.memory_space<vmem>>, %arg6: memref<1x8x32xf32, #tpu.memory_space<vmem>>, %arg7: memref<1x1x1x128xf32, #tpu.memory_space<vmem>>, %arg8: memref<1x1x1x128xf32, #tpu.memory_space<vmem>>) attributes {dimension_semantics = [#tpu.dimension_semantics<parallel>, #tpu.dimension_semantics<parallel>], iteration_bounds = array<i64: 2, 1>, scalar_prefetch = 0 : i64, scratch_operands = 0 : i64, tpu.core_type = #tpu.core_type<tc>, window_params = [{transform_indices = @transform_0, window_bounds = array<i64: 8, 1>}, {pipeline_mode = #tpu.pipeline_mode<synchronous>, transform_indices = @transform_1, window_bounds = array<i64: 1, 8>}, {transform_indices = @transform_2, window_bounds = array<i64: 8, 1>}, {transform_indices = @transform_3, window_bounds = array<i64: 1, 8, 32>}, {transform_indices = @transform_4, window_bounds = array<i64: 1, 8, 32>}, {transform_indices = @transform_5, window_bounds = array<i64: 1, 1, 1, 128>}, {transform_indices = @transform_6, window_bounds = array<i64: 1, 1, 1, 128>}]} {
    %c0 = arith.constant 0 : index
    %c0_0 = arith.constant 0 : index
    %c0_1 = arith.constant 0 : index
    %0 = vector.load %arg5[%c0, %c0_0, %c0_1] : memref<1x8x32xf32, #tpu.memory_space<vmem>>, vector<1x8x32xf32>
    %1 = vector.shape_cast %0 : vector<1x8x32xf32> to vector<8x32xf32>
    %c0_2 = arith.constant 0 : index
    %c0_3 = arith.constant 0 : index
    %c0_4 = arith.constant 0 : index
    %2 = vector.load %arg6[%c0_2, %c0_3, %c0_4] : memref<1x8x32xf32, #tpu.memory_space<vmem>>, vector<1x8x32xf32>
    %3 = vector.shape_cast %2 : vector<1x8x32xf32> to vector<8x32xf32>
    %cst = arith.constant dense<0.000000e+00> : vector<8x8xf32>
    %4 = tpu.matmul %1, %3, %cst {dimension_numbers = #tpu.dot_dimension_numbers<[1], [1], [0], [0], [0, 0, 1, 0], [], []>} : vector<8x32xf32>, vector<8x32xf32>, vector<8x8xf32> -> vector<8x8xf32>
    %c0_5 = arith.constant 0 : index
    %c0_6 = arith.constant 0 : index
    %5 = vector.load %arg2[%c0_5, %c0_6] : memref<8x1xi32, #tpu.memory_space<vmem>>, vector<8x1xi32>
    %c0_7 = arith.constant 0 : index
    %c0_8 = arith.constant 0 : index
    %6 = vector.load %arg3[%c0_7, %c0_8] : memref<1x8xi32, #tpu.memory_space<vmem>>, vector<1x8xi32>
    %7 = vector.broadcast %5 : vector<8x1xi32> to vector<8x8xi32>
    %8 = vector.broadcast %6 : vector<1x8xi32> to vector<8x8xi32>
    %9 = arith.cmpi eq, %7, %8 : vector<8x8xi32>
    %cst_9 = arith.constant 1.000000e+00 : f32
    %10 = vector.broadcast %cst_9 : f32 to vector<8x8xf32>
    %11 = arith.cmpf olt, %4, %10 : vector<8x8xf32>
    %12 = arith.andi %9, %11 : vector<8x8xi1>
    %cst_10 = arith.constant 0.000000e+00 : f32
    %13 = vector.broadcast %cst_10 : f32 to vector<8x8xf32>
    %14 = arith.select %12, %4, %13 : vector<8x8xi1>, vector<8x8xf32>
    %15 = arith.extui %12 : vector<8x8xi1> to vector<8x8xi32>
    %16 = arith.sitofp %15 : vector<8x8xi32> to vector<8x8xf32>
    %cst_11 = arith.constant 5.000000e-01 : f32
    %17 = vector.broadcast %cst_11 : f32 to vector<8x8xf32>
    %18 = arith.subf %4, %17 : vector<8x8xf32>
    %cst_12 = arith.constant 0.000000e+00 : f32
    %19 = vector.broadcast %cst_12 : f32 to vector<8x8xf32>
    %20 = arith.maximumf %18, %19 : vector<8x8xf32>
    %cst_13 = arith.constant 0.000000e+00 : f32
    %21 = vector.broadcast %cst_13 : f32 to vector<8x8xf32>
    %22 = arith.select %9, %21, %20 : vector<8x8xi1>, vector<8x8xf32>
    %cst_14 = arith.constant 1.000000e+00 : f32
    %23 = vector.broadcast %cst_14 : f32 to vector<8x1xf32>
    %cst_15 = arith.constant dense<0.000000e+00> : vector<8x1xf32>
    %24 = tpu.matmul %14, %23, %cst_15 {dimension_numbers = #tpu.dot_dimension_numbers<[1], [0], [0], [1], [0, 0, 1, 1], [], []>} : vector<8x8xf32>, vector<8x1xf32>, vector<8x1xf32> -> vector<8x1xf32>
    %cst_16 = arith.constant dense<0.000000e+00> : vector<8x1xf32>
    %25 = tpu.matmul %16, %23, %cst_16 {dimension_numbers = #tpu.dot_dimension_numbers<[1], [0], [0], [1], [0, 0, 1, 1], [], []>} : vector<8x8xf32>, vector<8x1xf32>, vector<8x1xf32> -> vector<8x1xf32>
    %cst_17 = arith.constant dense<0.000000e+00> : vector<8x1xf32>
    %26 = tpu.matmul %22, %23, %cst_17 {dimension_numbers = #tpu.dot_dimension_numbers<[1], [0], [0], [1], [0, 0, 1, 1], [], []>} : vector<8x8xf32>, vector<8x1xf32>, vector<8x1xf32> -> vector<8x1xf32>
    %c0_18 = arith.constant 0 : index
    %c0_19 = arith.constant 0 : index
    %27 = vector.load %arg4[%c0_18, %c0_19] : memref<8x1xf32, #tpu.memory_space<vmem>>, vector<8x1xf32>
    %c8_i32 = arith.constant 8 : i32
    %28 = arith.muli %arg1, %c8_i32 : i32
    %29 = tpu.iota {dimensions = array<i32: 0>} : vector<8x1xi32>
    %30 = vector.broadcast %28 : i32 to vector<8x1xi32>
    %31 = arith.addi %30, %29 : vector<8x1xi32>
    %cst_20 = arith.constant 1.000000e+00 : f32
    %32 = vector.broadcast %cst_20 : f32 to vector<8x1xf32>
    %33 = arith.cmpf oge, %25, %32 : vector<8x1xf32>
    %cst_21 = arith.constant 1.000000e+00 : f32
    %34 = vector.broadcast %cst_21 : f32 to vector<8x1xf32>
    %35 = arith.cmpf oge, %27, %34 : vector<8x1xf32>
    %36 = arith.andi %33, %35 : vector<8x1xi1>
    %c8_i32_22 = arith.constant 8 : i32
    %37 = vector.broadcast %c8_i32_22 : i32 to vector<8x1xi32>
    %38 = arith.cmpi slt, %31, %37 : vector<8x1xi32>
    %39 = arith.andi %36, %38 : vector<8x1xi1>
    %cst_23 = arith.constant 1.000000e+00 : f32
    %40 = vector.broadcast %cst_23 : f32 to vector<8x1xf32>
    %41 = arith.maximumf %25, %40 : vector<8x1xf32>
    %42 = arith.divf %24, %41 : vector<8x1xf32>
    %cst_24 = arith.constant 1.000000e+00 : f32
    %43 = vector.broadcast %cst_24 : f32 to vector<8x1xf32>
    %44 = arith.maximumf %27, %43 : vector<8x1xf32>
    %45 = arith.divf %26, %44 : vector<8x1xf32>
    %46 = arith.subf %45, %42 : vector<8x1xf32>
    %cst_25 = arith.constant 0.000000e+00 : f32
    %47 = vector.broadcast %cst_25 : f32 to vector<8x1xf32>
    %48 = arith.select %39, %46, %47 : vector<8x1xi1>, vector<8x1xf32>
    %49 = arith.extui %39 : vector<8x1xi1> to vector<8x1xi32>
    %50 = arith.sitofp %49 : vector<8x1xi32> to vector<8x1xf32>
    %cst_26 = arith.constant dense<0.000000e+00> : vector<1xf32>
    %51 = vector.multi_reduction <add>, %48, %cst_26 [0] : vector<8x1xf32> to vector<1xf32>
    %52 = vector.shape_cast %51 : vector<1xf32> to vector<1x1xf32>
    %cst_27 = arith.constant dense<0.000000e+00> : vector<1xf32>
    %53 = vector.multi_reduction <add>, %50, %cst_27 [0] : vector<8x1xf32> to vector<1xf32>
    %54 = vector.shape_cast %53 : vector<1xf32> to vector<1x1xf32>
    %55 = vector.shape_cast %52 : vector<1x1xf32> to vector<1x1xf32>
    %56 = vector.broadcast %55 : vector<1x1xf32> to vector<1x128xf32>
    %c0_28 = arith.constant 0 : index
    %c0_29 = arith.constant 0 : index
    %c0_30 = arith.constant 0 : index
    %c0_31 = arith.constant 0 : index
    %57 = vector.load %arg7[%c0_28, %c0_29, %c0_30, %c0_31] : memref<1x1x1x128xf32, #tpu.memory_space<vmem>>, vector<1x1x1x128xf32>
    %58 = vector.shape_cast %57 : vector<1x1x1x128xf32> to vector<1x128xf32>
    %59 = vector.shape_cast %56 : vector<1x128xf32> to vector<1x1x1x128xf32>
    tpu.vector_store %arg7[%c0_28, %c0_29, %c0_30, %c0_31], %59 {strides = array<i32>} : memref<1x1x1x128xf32, #tpu.memory_space<vmem>>, vector<1x1x1x128xf32>,
    %60 = vector.shape_cast %54 : vector<1x1xf32> to vector<1x1xf32>
    %61 = vector.broadcast %60 : vector<1x1xf32> to vector<1x128xf32>
    %c0_32 = arith.constant 0 : index
    %c0_33 = arith.constant 0 : index
    %c0_34 = arith.constant 0 : index
    %c0_35 = arith.constant 0 : index
    %62 = vector.load %arg8[%c0_32, %c0_33, %c0_34, %c0_35] : memref<1x1x1x128xf32, #tpu.memory_space<vmem>>, vector<1x1x1x128xf32>
    %63 = vector.shape_cast %62 : vector<1x1x1x128xf32> to vector<1x128xf32>
    %64 = vector.shape_cast %61 : vector<1x128xf32> to vector<1x1x1x128xf32>
    tpu.vector_store %arg8[%c0_32, %c0_33, %c0_34, %c0_35], %64 {strides = array<i32>} : memref<1x1x1x128xf32, #tpu.memory_space<vmem>>, vector<1x1x1x128xf32>,
    return
  }
  func.func @transform_0(%arg0: i32, %arg1: i32) -> (i32, i32) {
    %c0_i32 = arith.constant 0 : i32
    %c0_i32_0 = arith.constant 0 : i32
    return %arg1, %c0_i32 : i32, i32
  }
  func.func @transform_1(%arg0: i32, %arg1: i32) -> (i32, i32) {
    %c0_i32 = arith.constant 0 : i32
    %c0_i32_0 = arith.constant 0 : i32
    %c0_i32_1 = arith.constant 0 : i32
    return %c0_i32, %c0_i32_0 : i32, i32
  }
  func.func @transform_2(%arg0: i32, %arg1: i32) -> (i32, i32) {
    %c0_i32 = arith.constant 0 : i32
    %c0_i32_0 = arith.constant 0 : i32
    return %arg1, %c0_i32 : i32, i32
  }
  func.func @transform_3(%arg0: i32, %arg1: i32) -> (i32, i32, i32) {
    %c0_i32 = arith.constant 0 : i32
    %c0_i32_0 = arith.constant 0 : i32
    return %arg0, %arg1, %c0_i32 : i32, i32, i32
  }
  func.func @transform_4(%arg0: i32, %arg1: i32) -> (i32, i32, i32) {
    %c0_i32 = arith.constant 0 : i32
    %c0_i32_0 = arith.constant 0 : i32
    %c0_i32_1 = arith.constant 0 : i32
    return %arg0, %c0_i32, %c0_i32_0 : i32, i32, i32
  }
  func.func @transform_5(%arg0: i32, %arg1: i32) -> (i32, i32, i32, i32) {
    %c0_i32 = arith.constant 0 : i32
    %c0_i32_0 = arith.constant 0 : i32
    %c0_i32_1 = arith.constant 0 : i32
    return %arg0, %arg1, %c0_i32, %c0_i32_0 : i32, i32, i32, i32
  }
  func.func @transform_6(%arg0: i32, %arg1: i32) -> (i32, i32, i32, i32) {
    %c0_i32 = arith.constant 0 : i32
    %c0_i32_0 = arith.constant 0 : i32
    %c0_i32_1 = arith.constant 0 : i32
    return %arg0, %arg1, %c0_i32, %c0_i32_0 : i32, i32, i32, i32
  }
}

</mosaic_0001>

<bundles_post_ra>
// kernel: tpu_custom_call.1
= control target key start
LH: loop header
LB: loop body
LE: loop exit
PB: predicated region body
PF: predicated region fallthrough
CT: control target
= control target key end

     0   :  { %12 = vsyncpa [#allocation3], 0  ;;  %s1407_s0 = inlined_call_operand.vmem [shape: s32[8,1], index: 0, kind: input, shape index: {}]   ;;  %s1408_s1 = inlined_call_operand.vmem [shape: s32[1,8], index: 1, kind: input, shape index: {}]   ;;  %s1409_s2 = inlined_call_operand.vmem [shape: f32[8,1], index: 2, kind: input, shape index: {}]   ;;  %s1410_s3 = inlined_call_operand.vmem [shape: f32[2,8,32], index: 3, kind: input, shape index: {}]   ;;  %s1411_s4 = inlined_call_operand.hbm [shape: f32[2,8,32], index: 4, kind: input, shape index: {}]   ;;  %s1412_s5 = inlined_call_operand.hbm [shape: f32[2,1,1,128], index: 5, kind: output, shape index: {0}]   ;;  %s1413_s6 = inlined_call_operand.hbm [shape: f32[2,1,1,128], index: 6, kind: output, shape index: {1}]  }
   0x1   :  { %14 = vsyncpa [#allocation3 + $0x1], 0 }
   0x2   :  { %15 = vsyncpa [#allocation4], 0 }
   0x3   :  { %17 = vsyncpa [#allocation4 + $0x1], 0 }
   0x4   :  { %18 = vsyncpa [#allocation7], 0 }
   0x5   :  { %20 = vsyncpa [#allocation7 + $0x1], 0  ;;  %s1211_s21 = smov 0   ;;  %s1213_s22 = smov 0  }
   0x6   :  { %s1215_s23 = smov 0   ;;  %s1217_s24 = smov 0  }
   0x7   :  { %s1219_s25 = smov 0   ;;  %s1221_s26 = smov 0  }
   0x8 LB: > { %s900_s27 = sadd.s32 4294967295, %s1167_s26   ;;  %s901_s28 = sadd.s32 4294967294, %s1167_s26   ;;  %s1167_s26 = sphi %s1221_s26, %s26_s26   ;;  %s1163_s25 = sphi %s1219_s25, %s1429_s25   ;;  %s1159_s24 = sphi %s1217_s24, %s1428_s24   ;;  %s1155_s23 = sphi %s1215_s23, %s1427_s23   ;;  %s1151_s22 = sphi %s1213_s22, %s1426_s22   ;;  %s1147_s21 = sphi %s1211_s21, %s1425_s21  }
   0x9   : > { %s38_s29 = sadd.s32 1, %s1163_s25  ;;  %s146_s30 = sadd.s32 1, %s1155_s23 }
   0xa   : > { %p40_p0 = scmp.ge.s32.totalorder %s38_s29, 2  ;;  %p153_p1 = scmp.ne.s32.totalorder %s1155_s23, %s1151_s22 }
   0xb   : > { %p154_p2 = scmp.eq.s32.totalorder %s1167_s26, 0  ;;  %p159_p3 = scmp.ne.s32.totalorder %s1151_s22, %s1147_s21 }
   0xc   : > { %s1431_s29 = smov (%p40_p0, %s38_s29), 0  ;;  %p160_p5 = scmp.eq.s32.totalorder %s900_s27, 0 }
   0xd   : > { %p1252_p4 = por %p154_p2, %p153_p1  ;;  %s143_s8 = ssub.s32 %s1163_s25, %s1431_s29 }
   0xe   : > { %p185_p6 = scmp.eq.s32.totalorder %s900_s27, 1  ;;  %p144_p7 = scmp.eq.s32.totalorder %s143_s8, 0 }
   0xf   : > { %p1258_p8 = por %p160_p5, %p159_p3  ;;  %p191_p10 = scmp.eq.s32.totalorder %s901_s28, 1 }
  0x10   : > { %p1262_p9 = por %p185_p6, %p153_p1  ;;  %p969_p13 = scmp.lt.s32.totalorder %s1167_s26, 2 }
  0x11   : > { %s1267_s11 = scalar_select %p144_p7, %s1155_s23, %s146_s30  }
  0x12   : > { %p1269_p11 = por %p191_p10, %p159_p3  ;;  %s266_s13 = sand.u32 1, %s1155_s23  }
  0x13   : > { %s906_s14 = sshll.u32 %s266_s13, 3  ;;  %s907_s15 = sshll.u32 %s1163_s25, 7 }
  0x14   : > { %s1418_s12 = scalar_select %p1269_p11, 1, 0 }
  0x15   : > { %s275_s18 = scalar_lea.hbm %s1411_s4, %s907_s15  ;;  %s270_s19 = scalar_lea.vmem [#allocation2], %s906_s14 }
  0x16   : > { %s277_s20 = sshll.u32 %s270_s19, 4  ;;  %p1282_p0 = pnand %p969_p13, %p1252_p4  ;;  %s278_s20 = int_to_ptr.vmem [resolvable:$true] %s277_s20 }
  0x17   : > { %p908_p1 = scmp.ge.s32.totalorder %s1167_s26, 1  ;;  %p282_p2 = scmp.lt.s32.totalorder %s1167_s26, 3 }
  0x18   : > { %s267_s28 = scalar_lea.sflag [#allocation3], %s266_s13  ;;  %p1031_p3 = pneg %p1282_p0 }
  0x19   : > { %s1042_s30 = scalar_lea.vmem %s278_s20, 128  ;;  %s1169_s8 = smov [#allocation2]  }
  0x1a   : > { %p1043_p5 = scmp.ne.s32.totalorder %s278_s20, %s1042_s30  ;;  %s1047_s15 = sshll.u32 %s1169_s8, 4  ;;  %s1048_s15 = int_to_ptr.vmem [resolvable:$false] %s1047_s15 }
  0x1b   : > { %s1049_s14 = scalar_lea.vmem %s1048_s15, 256  ;;  %p1050_p10 = scmp.lt.s32.totalorder %s278_s20, %s1048_s15 }
  0x1c   : > { %p1045_p6 = pnand %p1043_p5, %p1031_p3  ;;  %p1051_p12 = scmp.lt.s32.totalorder %s1049_s14, %s1042_s30 }
  0x1e   : > { %p1046_p7 = pneg %p1045_p6  ;;  %p1052_p4 = por %p1051_p12, %p1050_p10 }
  0x20   : > { %p1053_p13 = pnand %p1052_p4, %p1046_p7 }
  0x22   : > { %1056 = shalt.err (!%p1053_p13)
}
  0x23   : > { %961 = dma.hbm_to_vmem [thread:$0]  (!%p1282_p0), %s275_s18, 128, %s278_s20, %s267_s28  }
  0x24   : > { %p283_p11 = pnand %p908_p1, %p282_p2 }
  0x25   : > { %s1297_s7 = sand.u32 (!%p283_p11), 1, %s1151_s22  }
  0x26   : > { %286 = sbr.rel (%p283_p11) target bundleno = 621 (0x26d), region = 40  ;;  %s909_s13 = sshll.u32 (!%p283_p11), %s1297_s7, 3 }
  0x27   : > { %s289_s16 = scalar_lea.sflag (!%p283_p11), [#allocation3], %s1297_s7  ;;  %s292_s17 = scalar_lea.vmem (!%p283_p11), [#allocation2], %s909_s13 }
  0x2b   : > { %1134 = dma.done.wait (%p1258_p8), %s289_s16, 128  }
  0x2c   : > { %1136 = vsyncadd (%p1258_p8), %s289_s16, 4294967168  ;;  %p347_p12 = scmp.lt.s32.totalorder %s1159_s24, 1  ;;  %v1170_v0 = vmov 0.0   ;;  %vm1171_vm0 = vmmov 0   ;;  %v1172_v1 = vmov 0   ;;  %vm356_vm1 = vcmask 261120  }
  0x2d   : > { %932 = vmatprep.subr.mxu0 %v1170_v0  ;;  %934 = vmatprep.mubr.msk.f32.mxu0 %vm1171_vm0, %v1170_v0  ;;  %v355_v2 = vld [vmem:[%s292_s17] sm:$0xff]  ;;  %v433_v3 = vld [vmem:[%s1407_s0] sm:$0xff]  ;;  %v1173_v5 = vmov 1.0   ;;  %vm451_vm4 = vcmask 64512   ;;  %vm692_vm8 = vcmask 7168   ;;  %s338_s16 = scalar_lea.vmem [#allocation6], %s1297_s7 }
  0x2e   : > { %s348_s18 = scalar_select %p347_p12, %s1159_s24, 1  ;;  %1023 = vset.pattern.permute.xlu0 %v1172_v1  ;;  %937 = vmatprep.subr.mxu1 %v1170_v0  ;;  %v913_v6 = vld [vmem:[%s1408_s1] ss:$0 sm:$0xff] }
  0x2f   : > { %939 = vmatprep.mubr.msk.f32.mxu1 %vm1171_vm0, %v1170_v0  ;;  %1024 = vset.pattern.permute.xlu1 %v1172_v1  ;;  %v671_v15 = vld [vmem:[%s1409_s2] sm:$0xff]  ;;  %s751_s17 = sshll.u32 %s338_s16, 4  ;;  %s1174_s30 = smov [#allocation6]   ;;  %s1335_s17 = int_to_ptr.vmem [resolvable:$true] %s751_s17 }
  0x30   : > { %s910_s19 = sshll.u32 %s348_s18, 3  ;;  %933 = vmatpush3.xpose.msk.msra.mxu0 %vm356_vm1, %v355_v2  ;;  %436 = vperm.xlu0 %1023, %v433_v3   ;;  %v685_v17 = vmax.f32 %v671_v15, 1.0  ;;  %vm678_vm6 = vcmp.ge.f32.partialorder %v671_v15, 1.0  ;;  %s1414_s18 = sshll.u32 %s1159_s24, 4 }
  0x31   : > { %s353_s27 = scalar_lea.vmem %s1410_s3, %s910_s19  ;;  %947 = vmatprep.subr.mxu0 %v1170_v0  ;;  %938 = vmatpush3.msra.mxu1 %v1173_v5  ;;  %s749_s9 = scalar_lea.hbm %s1413_s6, %s1414_s18 }
  0x32   : > { %v354_v4 = vld [vmem:[%s353_s27] sm:$0xff]  ;;  %942 = vmatprep.subr.mxu1 %v1170_v0  ;;  %1025 = vrcp.f32 %v685_v17  ;;  %s724_s27 = scalar_lea.sflag [#allocation7], %s1297_s7  ;;  %s1057_s28 = scalar_lea.vmem %s1335_s17, 16 }
  0x33   : > { %935 = vmatmul.mubr.msk.f32.vlgmr.msra.gmra.mxu0 %vm356_vm1, %v354_v4  ;;  %p1058_p8 = scmp.ne.s32.totalorder %s1335_s17, %s1057_s28  ;;  %s1061_s8 = sshll.u32 %s1174_s30, 4  ;;  %s1062_s8 = int_to_ptr.vmem [resolvable:$false] %s1061_s8 }
  0x34   : > { %949 = vmatprep.mubr.msk.f32.mxu0 %vm1171_vm0, %v1170_v0  ;;  %948 = vmatpush3.msra.mxu0 %v1173_v5  ;;  %s1063_s15 = scalar_lea.vmem %s1062_s8, 32  ;;  %p1064_p1 = scmp.lt.s32.totalorder %s1335_s17, %s1062_s8 }
  0x35   : > { %p1059_p11 = pnand %p1058_p8, %p1262_p9  ;;  %p1065_p2 = scmp.lt.s32.totalorder %s1063_s15, %s1057_s28 }
  0x37   : > { %p1060_p0 = pneg %p1059_p11  ;;  %p1066_p3 = por %p1065_p2, %p1064_p1 }
  0x39   : > { %p1067_p5 = pnand %p1066_p3, %p1060_p0 }
  0x3f   : > { %v1026_v32 = vpop.eup %1025 }
  0xab   : > { %v437_v7 = vpop.permute.xlu0 %436 }
  0xac   : > { %vm442_vm2 = vcmp.eq.s32.totalorder %v437_v7, %v913_v6 }
  0xf3   : > { %v429_v8 = vpop.f32.mrf.mxu0 }
  0xf4   : > { %vm443_vm3 = vcmp.lt.f32.partialorder %v429_v8, 1.0  ;;  %v915_v9 = vadd.f32 -0.5, %v429_v8 }
  0xf5   : > { %v936_v10 = vpop.f32.mrf.mxu0  ;;  %vm444_vm5 = vmand %vm442_vm2, %vm443_vm3 }
  0xf6   : > { %v449_v11 = vmax.f32 %v915_v9, 0.0  ;;  %v445_v12 = vsel %vm444_vm5, %v429_v8, 0.0  ;;  %v914_v14 = vsel %vm444_vm5, 1.0, %v1170_v0 }
  0xf7   : > { %940 = vmatmul.mubr.msk.f32.vlgmr.msra.gmra.mxu1 %vm451_vm4, %v445_v12 }
  0xf8   : > { %943 = vmatpush3.msra.mxu1 %v1173_v5  ;;  %v450_v13 = vsel %vm442_vm2, 0.0, %v449_v11  ;;  %944 = vmatprep.mubr.msk.f32.mxu1 %vm1171_vm0, %v1170_v0 }
  0xf9   : > { %950 = vmatmul.mubr.msk.f32.vlgmr.msra.gmra.mxu0 %vm451_vm4, %v450_v13 }
  0xfb   : > { %945 = vmatmul.mubr.msk.f32.vlgmr.msra.gmra.mxu1 %vm451_vm4, %v914_v14 }
 0x1b7   : > { %v521_v16 = vpop.f32.mrf.mxu1 }
 0x1b9   : > { %v941_v18 = vpop.f32.mrf.mxu1  ;;  %v667_v19 = vpop.f32.mrf.mxu0 }
 0x1ba   : > { %v687_v35 = vmul.f32 %v1026_v32, %v667_v19 }
 0x1bb   : > { %v594_v20 = vpop.f32.mrf.mxu1  ;;  %v951_v21 = vpop.f32.mrf.mxu0 }
 0x1bc   : > { %vm677_vm7 = vcmp.ge.f32.partialorder %v594_v20, 1.0  ;;  %v682_v22 = vmax.f32 %v594_v20, 1.0 }
 0x1bd   : > { %vm1323_vm9 = vmand %vm677_vm7, %vm678_vm6  ;;  %v946_v24 = vpop.f32.mrf.mxu1 }
 0x1be   : > { %1027 = vrcp.f32 %v682_v22  ;;  %v919_v25 = vsel %vm1323_vm9, 1.0, %v1170_v0 }
 0x1bf   : > { %v700_v26 = vsel %vm692_vm8, %v919_v25, 0.0 }
 0x1c0   : > { %v701_v27 = vrot.slane %v700_v26, 4 }
 0x1c2   : > { %v702_v28 = vadd.f32 %v701_v27, %v700_v26 }
 0x1c4   : > { %v703_v29 = vrot.slane %v702_v28, 2 }
 0x1c6   : > { %v704_v30 = vadd.f32 %v703_v29, %v702_v28 }
 0x1c8   : > { %v705_v31 = vrot.slane %v704_v30, 1 }
 0x1ca   : > { %v706_v33 = vadd.f32 %v705_v31, %v704_v30 }
 0x1cb   : > { %v1028_v34 = vpop.eup %1027 }
 0x1cc   : > { %v684_v36 = vmul.f32 %v1028_v34, %v521_v16  ;;  %715 = vperm.xlu1 %1024, %v706_v33  }
 0x1ce   : > { %v688_v37 = vsub.f32 %v687_v35, %v684_v36 }
 0x1d0   : > { %v689_v38 = vsel %vm1323_vm9, %v688_v37, 0.0 }
 0x1d1   : > { %v693_v39 = vsel %vm692_vm8, %v689_v38, 0.0 }
 0x1d2   : > { %v694_v40 = vrot.slane %v693_v39, 4 }
 0x1d4   : > { %v695_v41 = vadd.f32 %v694_v40, %v693_v39 }
 0x1d6   : > { %v696_v42 = vrot.slane %v695_v41, 2 }
 0x1d8   : > { %v697_v43 = vadd.f32 %v696_v42, %v695_v41 }
 0x1da   : > { %v698_v44 = vrot.slane %v697_v43, 1 }
 0x1dc   : > { %v699_v45 = vadd.f32 %v698_v44, %v697_v43 }
 0x1de   : > { %709 = vperm.xlu0 %1023, %v699_v45  }
 0x247   : > { %v716_v46 = vpop.permute.xlu1 %715 }
 0x248   : > { %718 = vst [vmem:[%s338_s16] sm:$0x1] %v716_v46 }
 0x249   : > { %1070 = shalt.err (!%p1067_p5)
}
 0x24a   : > { %s1071_s14 = scalar_lea.hbm %s749_s9, 16  ;;  %s1075_s19 = scalar_lea.hbm %s1413_s6, 32 }
 0x24b   : > { %p1072_p6 = scmp.ne.s32.totalorder %s749_s9, %s1071_s14  ;;  %p1076_p4 = scmp.lt.s32.totalorder %s749_s9, %s1413_s6 }
 0x24c   : > { %p1077_p13 = scmp.lt.s32.totalorder %s1075_s19, %s1071_s14 }
 0x24d   : > { %p1073_p7 = pnand %p1072_p6, %p1262_p9 }
 0x24e   : > { %p1078_p12 = por %p1077_p13, %p1076_p4 }
 0x24f   : > { %p1074_p10 = pneg %p1073_p7 }
 0x251   : > { %p1079_p8 = pnand %p1078_p12, %p1074_p10 }
 0x253   : > { %1082 = shalt.err (!%p1079_p8)
}
 0x254   : > { %955 = dma.vmem_to_hbm [thread:$0]  (%p1262_p9), %s1335_s17, 16, %s749_s9, %s724_s27  }
 0x255   : > { %s332_s28 = scalar_lea.vmem [#allocation5], %s1297_s7  ;;  %s1422_s8 = sshll.u32 %s1159_s24, 4 }
 0x256   : > { %s737_s30 = sshll.u32 %s332_s28, 4  ;;  %s735_s14 = scalar_lea.hbm %s1412_s5, %s1422_s8  ;;  %s1360_s30 = int_to_ptr.vmem [resolvable:$true] %s737_s30 }
 0x257   : > { %s720_s13 = scalar_lea.sflag [#allocation4], %s1297_s7  ;;  %s1083_s16 = scalar_lea.vmem %s1360_s30, 16 }
 0x258   : > { %p1084_p11 = scmp.ne.s32.totalorder %s1360_s30, %s1083_s16  ;;  %s1175_s17 = smov [#allocation5]  }
 0x259   : > { %v710_v47 = vpop.permute.xlu0 %709  ;;  %s1087_s9 = sshll.u32 %s1175_s17, 4  ;;  %s1088_s9 = int_to_ptr.vmem [resolvable:$false] %s1087_s9 }
 0x25a   : > { %712 = vst [vmem:[%s332_s28] sm:$0x1] %v710_v47  ;;  %p1085_p0 = pnand %p1084_p11, %p1262_p9  ;;  %s1089_s27 = scalar_lea.vmem %s1088_s9, 32 }
 0x25b   : > { %p1090_p2 = scmp.lt.s32.totalorder %s1360_s30, %s1088_s9  ;;  %p1091_p3 = scmp.lt.s32.totalorder %s1089_s27, %s1083_s16 }
 0x25c   : > { %p1086_p1 = pneg %p1085_p0 }
 0x25d   : > { %p1092_p5 = por %p1091_p3, %p1090_p2 }
 0x25f   : > { %p1093_p6 = pnand %p1092_p5, %p1086_p1 }
 0x261   : > { %1096 = shalt.err (!%p1093_p6)
}
 0x262   : > { %s1097_s24 = scalar_lea.hbm %s735_s14, 16  ;;  %s1101_s20 = scalar_lea.hbm %s1412_s5, 32 }
 0x263   : > { %p1098_p7 = scmp.ne.s32.totalorder %s735_s14, %s1097_s24  ;;  %p1102_p13 = scmp.lt.s32.totalorder %s735_s14, %s1412_s5 }
 0x264   : > { %p1103_p12 = scmp.lt.s32.totalorder %s1101_s20, %s1097_s24 }
 0x265   : > { %p1099_p10 = pnand %p1098_p7, %p1262_p9 }
 0x266   : > { %p1104_p8 = por %p1103_p12, %p1102_p13 }
 0x267   : > { %p1100_p4 = pneg %p1099_p10 }
 0x269   : > { %p1105_p11 = pnand %p1104_p8, %p1100_p4 }
 0x26b   : > { %1108 = shalt.err (!%p1105_p11)
}
 0x26c   : > { %954 = dma.vmem_to_hbm [thread:$0]  (%p1262_p9), %s1360_s30, 16, %s735_s14, %s720_s13  }
 0x26d PF: > { %s763_s15 = sand.u32 1, %s1147_s21   ;;  %p1423_p0 = scmp.ne.s32.totalorder %s1418_s12, 0 }
 0x26e   : > { %p1424_p1 = scmp.ge.s32.totalorder %s1167_s26, 2  ;;  %s764_s18 = scalar_lea.sflag [#allocation4], %s763_s15 }
 0x270   : > { %p963_p2 = pnand %p1424_p1, %p1423_p0 }
 0x272   : > { %p964_p3 = pneg %p963_p2 }
 0x274   : > { %1138 = dma.done.wait (%p964_p3), %s764_s18, 16  }
 0x275   : > { %1140 = vsyncadd (%p964_p3), %s764_s18, 4294967280  ;;  %s772_s16 = scalar_lea.sflag [#allocation7], %s763_s15 }
 0x276   : > { %1142 = dma.done.wait (%p964_p3), %s772_s16, 16  }
 0x277   : > { %1144 = vsyncadd (%p964_p3), %s772_s16, 4294967280  ;;  %s26_s26 = sadd.s32 1, %s1167_s26   ;;  %s1425_s21 = smov %s1151_s22 }
 0x278   : > { %p23_p5 = scmp.ge.s32.totalorder %s26_s26, 4   ;;  %s1426_s22 = smov %s1155_s23 }
 0x279   : > { %s1427_s23 = smov %s1267_s11  ;;  %s1428_s24 = smov %s1163_s25 }
 0x27a   : > { %s1429_s25 = smov %s1431_s29  ;;  %25 = sbr.rel (!%p23_p5) target bundleno = 8 (0x8), region = 111 }
 0x27f   :  { %776 = vsyncpa [#allocation3], 1 }
 0x280   :  { %778 = vsyncpa [#allocation3 + $0x1], 1 }
 0x281   :  { %779 = vsyncpa [#allocation4], 1 }
 0x282   :  { %781 = vsyncpa [#allocation4 + $0x1], 1 }
 0x283   :  { %782 = vsyncpa [#allocation7], 1 }
 0x284   :  { %784 = vsyncpa [#allocation7 + $0x1], 1 }

</bundles_post_ra>
